<compile_context>
chip_gen: v7x
topology: tpu7x:2x2x1
jax: 0.10.0
libtpu: 0.0.40
codegen_flags: <defaults>
</compile_context>

<pallas_src>
import numpy as np
import jax
import jax.numpy as jnp
from jax.experimental import pallas as pl
from jax.experimental.pallas import tpu as pltpu


# ----------------------------------------------------------------------------
# Kernel: one batch tile of the folded GEMV.
#   x_ref: (TB, D)   input rows (f32 or bf16)
#   w_ref: (1, D)    folded effective weight (f32, resident across grid)
#   b_ref: (1, 1)    folded effective bias (f32)
#   o_ref: (TB, 1)   output scores (f32)
# ----------------------------------------------------------------------------
def _gemv_kernel(x_ref, w_ref, b_ref, o_ref):
    x = x_ref[...].astype(jnp.float32)            # in-register cast (no-op for f32)
    w = w_ref[...]                                # (1, D), broadcasts over rows
    acc = jnp.sum(x * w, axis=-1, keepdims=True)  # VPU mul + XLU lane reduce -> (TB, 1)
    o_ref[...] = (acc + b_ref[...]).astype(o_ref.dtype)


# ----------------------------------------------------------------------------
# One-time param prep (host, float64): fold the 5 PyTorch-shaped linears into
# (w_eff, b_eff).  y = (((x W1^T + b1) W2^T + b2) ... ) W5^T + b5 == x A + c.
# ----------------------------------------------------------------------------
def fold_params(params):
    a = np.asarray(params["w1"], dtype=np.float64).T          # (D, 1024)
    c = np.asarray(params["b1"], dtype=np.float64).reshape(1, -1)
    for i in range(2, 6):
        wt = np.asarray(params[f"w{i}"], dtype=np.float64).T  # (in, out)
        a = a @ wt
        c = c @ wt + np.asarray(params[f"b{i}"], dtype=np.float64).reshape(1, -1)
    w_eff = jnp.asarray(a.T, dtype=jnp.float32)   # (1, D)
    b_eff = jnp.asarray(c.reshape(1, 1), dtype=jnp.float32)
    return w_eff, b_eff


# ----------------------------------------------------------------------------
# Generation-aware VMEM budgets.
# ----------------------------------------------------------------------------
def _vmem_capacity_bytes():
    try:
        info = pltpu.get_tpu_info()
        cap = getattr(info, "vmem_capacity_bytes", None)
        if cap:
            return int(cap)
    except Exception:
        pass
    return 64 * 1024 * 1024  # conservative default (v7x per-TC VMEM)


def _budgets():
    cap = _vmem_capacity_bytes()
    if cap >= 128 * 1024 * 1024:      # v5e / v6e class (128 MiB physical VMEM)
        per_x_buffer = 24 * 1024 * 1024
        vmem_limit = 96 * 1024 * 1024
    else:                              # v7x class (64 MiB per TensorCore)
        per_x_buffer = 12 * 1024 * 1024
        vmem_limit = 48 * 1024 * 1024
    return per_x_buffer, vmem_limit


def _choose_batch_tile(B, D, dtype, per_buffer_budget):
    """Largest batch tile whose *lane-padded* x tile fits the per-buffer byte
    budget (double-buffered by BlockSpec).  Rounded to the sublane packing of
    the input dtype (16 rows for 2-byte dtypes, 8 for 4-byte)."""
    itemsize = jnp.dtype(dtype).itemsize
    sub = 16 if itemsize == 2 else 8
    lane_padded_d = pl.cdiv(D, 128) * 128
    row_bytes = lane_padded_d * itemsize
    tb = per_buffer_budget // max(1, row_bytes)
    tb = max(sub, (tb // sub) * sub)
    # Never allocate more rows than the (sublane-padded) batch needs.
    tb = min(tb, pl.cdiv(B, sub) * sub)
    return max(sub, tb)


# ----------------------------------------------------------------------------
# Wrapper: batch-tiled pallas_call over the folded GEMV (no jnp.pad copy).
# ----------------------------------------------------------------------------
def aesthetic_predictor_forward(x, folded):
    """x: [B, D] (f32 or bf16).  folded: (w_eff [1,D], b_eff [1,1])."""
    w_eff, b_eff = folded
    B, D = x.shape
    per_x_buffer, vmem_limit = _budgets()
    tb = _choose_batch_tile(B, D, x.dtype, per_x_buffer)

    out = pl.pallas_call(
        _gemv_kernel,
        out_shape=jax.ShapeDtypeStruct((B, 1), jnp.float32),
        grid=(pl.cdiv(B, tb),),                     # ragged last block is masked
        in_specs=[
            pl.BlockSpec((tb, D), lambda i: (i, 0)),   # x: batch-tiled stream
            pl.BlockSpec((1, D), lambda i: (0, 0)),    # w_eff: resident
            pl.BlockSpec((1, 1), lambda i: (0, 0)),    # b_eff: resident
        ],
        out_specs=pl.BlockSpec((tb, 1), lambda i: (i, 0)),
        compiler_params=pltpu.CompilerParams(
            dimension_semantics=("parallel",),         # shard batch across TCs
            vmem_limit_bytes=vmem_limit,               # generation-aware
        ),
    )(x, w_eff, b_eff)
    return out


# ----------------------------------------------------------------------------
# Test harness (deterministic, self-contained).
# ----------------------------------------------------------------------------
def init_params(input_size, key):
    """Synthetic init matching the PyTorch module's shapes ([out, in] weights)."""
    dims = [(1024, input_size), (128, 1024), (64, 128), (16, 64), (1, 16)]
    params = {}
    for i, (out_f, in_f) in enumerate(dims, start=1):
        key, kw, kb = jax.random.split(key, 3)
        bound = 1.0 / jnp.sqrt(in_f)
        params[f"w{i}"] = jax.random.uniform(
            kw, (out_f, in_f), jnp.float32, minval=-bound, maxval=bound)
        params[f"b{i}"] = jax.random.uniform(
            kb, (out_f,), jnp.float32, minval=-bound, maxval=bound)
    return params


def reference_forward(x, params):
    """Layer-by-layer reference matching the PyTorch module (dropout=identity)."""
    h = x
    for i in range(1, 6):
        h = h @ params[f"w{i}"].T + params[f"b{i}"]
    return h


if __name__ == "__main__":
    key = jax.random.PRNGKey(0)
    key, kx = jax.random.split(key)

    # B deliberately NOT a multiple of the tile so the ragged (masked) last
    # block path introduced by removing jnp.pad is exercised.
    B = 12
    INPUT_SIZE = 32
    x = jax.random.normal(kx, (B, INPUT_SIZE), jnp.float32)

    params = init_params(INPUT_SIZE, key)

    # One-time param folding (host float64, off the per-call hot path).
    folded = fold_params(params)

    # --- f32 input path -------------------------------------------------
    out = aesthetic_predictor_forward(x, folded)
    out = jax.block_until_ready(out)

    ref = reference_forward(x, params)
    assert out.shape == (B, 1), out.shape
    assert jnp.allclose(out, ref, atol=2e-4, rtol=1e-4), (
        f"f32 max abs err = {jnp.max(jnp.abs(out - ref))}")

    # --- bf16 input path (half the HBM traffic; f32 cast in-register) ----
    x_bf16 = x.astype(jnp.bfloat16)
    out_bf16 = jax.block_until_ready(aesthetic_predictor_forward(x_bf16, folded))
    ref_bf16 = reference_forward(x_bf16.astype(jnp.float32), params)
    assert out_bf16.shape == (B, 1), out_bf16.shape
    assert jnp.allclose(out_bf16, ref_bf16, atol=1e-3, rtol=1e-3), (
        f"bf16 max abs err = {jnp.max(jnp.abs(out_bf16 - ref_bf16))}")

    print("KERNEL_OK")
</pallas_src>

<mosaic_0001>
module attributes {stable_mosaic.version = 11 : i64} {
  func.func @_gemv_kernel(%arg0: i32, %arg1: memref<16x32xf32, #tpu.memory_space<vmem>>, %arg2: memref<1x32xf32, #tpu.memory_space<vmem>>, %arg3: memref<1x1xf32, #tpu.memory_space<vmem>>, %arg4: memref<16x1xf32, #tpu.memory_space<vmem>>) attributes {dimension_semantics = [#tpu.dimension_semantics<parallel>], iteration_bounds = array<i64: 1>, scalar_prefetch = 0 : i64, scratch_operands = 0 : i64, tpu.core_type = #tpu.core_type<tc>, window_params = [{transform_indices = @transform_0, window_bounds = array<i64: 16, 32>}, {pipeline_mode = #tpu.pipeline_mode<synchronous>, transform_indices = @transform_1, window_bounds = array<i64: 1, 32>}, {pipeline_mode = #tpu.pipeline_mode<synchronous>, transform_indices = @transform_2, window_bounds = array<i64: 1, 1>}, {transform_indices = @transform_3, window_bounds = array<i64: 16, 1>}]} {
    %c0 = arith.constant 0 : index
    %c0_0 = arith.constant 0 : index
    %0 = vector.load %arg1[%c0, %c0_0] : memref<16x32xf32, #tpu.memory_space<vmem>>, vector<16x32xf32>
    %c0_1 = arith.constant 0 : index
    %c0_2 = arith.constant 0 : index
    %1 = vector.load %arg2[%c0_1, %c0_2] : memref<1x32xf32, #tpu.memory_space<vmem>>, vector<1x32xf32>
    %2 = vector.broadcast %1 : vector<1x32xf32> to vector<16x32xf32>
    %3 = arith.mulf %0, %2 : vector<16x32xf32>
    %cst = arith.constant dense<0.000000e+00> : vector<16xf32>
    %4 = vector.multi_reduction <add>, %3, %cst [1] : vector<16x32xf32> to vector<16xf32>
    %5 = vector.shape_cast %4 : vector<16xf32> to vector<16x1xf32>
    %c0_3 = arith.constant 0 : index
    %c0_4 = arith.constant 0 : index
    %6 = vector.load %arg3[%c0_3, %c0_4] : memref<1x1xf32, #tpu.memory_space<vmem>>, vector<1x1xf32>
    %7 = vector.broadcast %6 : vector<1x1xf32> to vector<16x1xf32>
    %8 = arith.addf %5, %7 : vector<16x1xf32>
    %c0_5 = arith.constant 0 : index
    %c0_6 = arith.constant 0 : index
    %9 = vector.load %arg4[%c0_5, %c0_6] : memref<16x1xf32, #tpu.memory_space<vmem>>, vector<16x1xf32>
    tpu.vector_store %arg4[%c0_5, %c0_6], %8 {strides = array<i32>} : memref<16x1xf32, #tpu.memory_space<vmem>>, vector<16x1xf32>,
    return
  }
  func.func @transform_0(%arg0: i32) -> (i32, i32) {
    %c0_i32 = arith.constant 0 : i32
    %c0_i32_0 = arith.constant 0 : i32
    return %arg0, %c0_i32 : i32, i32
  }
  func.func @transform_1(%arg0: i32) -> (i32, i32) {
    %c0_i32 = arith.constant 0 : i32
    %c0_i32_0 = arith.constant 0 : i32
    %c0_i32_1 = arith.constant 0 : i32
    return %c0_i32, %c0_i32_0 : i32, i32
  }
  func.func @transform_2(%arg0: i32) -> (i32, i32) {
    %c0_i32 = arith.constant 0 : i32
    %c0_i32_0 = arith.constant 0 : i32
    %c0_i32_1 = arith.constant 0 : i32
    return %c0_i32, %c0_i32_0 : i32, i32
  }
  func.func @transform_3(%arg0: i32) -> (i32, i32) {
    %c0_i32 = arith.constant 0 : i32
    %c0_i32_0 = arith.constant 0 : i32
    return %arg0, %c0_i32 : i32, i32
  }
}

</mosaic_0001>

<bundles_post_ra>
// kernel: tpu_custom_call.1
= control target key start
LH: loop header
LB: loop body
LE: loop exit
PB: predicated region body
PF: predicated region fallthrough
CT: control target
= control target key end

     0   :  { %s141_s0 = inlined_call_operand.hbm [shape: f32[12,32], index: 0, kind: input, shape index: {}]   ;;  %s142_s1 = inlined_call_operand.vmem [shape: f32[1,32], index: 1, kind: input, shape index: {}]   ;;  %s143_s2 = inlined_call_operand.<no memory space> [shape: f32[1,1], index: 2, kind: input, shape index: {}]   ;;  %s144_s3 = inlined_call_operand.vmem [shape: f32[12,1], index: 3, kind: output, shape index: {}]  }
   0x1   :  { %v8_v0 = vstv %s143_s2 }
   0x2   :  { %9 = vst [vmem:[#allocation2] sm:$0x1] %v8_v0 }
   0x3   :  { %10 = vsyncpa [#allocation4], 0  ;;  %s94_s14 = smov [#allocation3]   ;;  %s70_s18 = scalar_lea.hbm %s141_s0, 256 }
   0x4   :  { %s16_s15 = sshll.u32 %s94_s14, 4  ;;  %p71_p0 = scmp.ne.s32.totalorder %s141_s0, %s70_s18  ;;  %s17_s15 = int_to_ptr.vmem [resolvable:$true] %s16_s15 }
   0x5   :  { %p74_p1 = scmp.lt.u32.totalorder %s70_s18, %s141_s0 }
   0x7   :  { %p76_p2 = pnand %p74_p1, %p71_p0 }
   0x9   :  { %79 = shalt.err (!%p76_p2)
}
   0xa   :  { %s80_s2 = scalar_lea.vmem %s17_s15, 256  ;;  %p85_p4 = scmp.lt.s32.totalorder %s17_s15, %s17_s15 }
   0xb   :  { %p81_p3 = scmp.ne.s32.totalorder %s17_s15, %s80_s2  ;;  %p86_p5 = scmp.lt.s32.totalorder %s80_s2, %s80_s2 }
   0xd   :  { %p87_p6 = por %p86_p5, %p85_p4 }
   0xf   :  { %p88_p7 = pnand %p87_p6, %p81_p3 }
  0x11   :  { %91 = shalt.err (!%p88_p7)
}
  0x12   :  { %s95_s23 = smov 128   ;;  %s96_s24 = smov 8  }
  0x13   :  { %22 = dma.hbm_to_vmem [thread:$0]  %s141_s0, 256, %s17_s15, [#allocation4], %s95_s23, %s95_s23, %s96_s24  }
  0x14   :  { %92 = dma.done.wait [#allocation4], 256  }
  0x15   :  { %93 = vsyncadd [#allocation4], 4294967040  ;;  %v30_v1 = vld [vmem:[#allocation3] sm:$0xff]  ;;  %v65_v2 = vld [vmem:[%s142_s1] ss:$0 sm:$0xff]  ;;  %vm41_vm0 = vcmask 261120  }
  0x16   :  { %v31_v3 = vld [vmem:[#allocation3 + $0x8] sm:$0xff]  ;;  %v39_v4 = vmul.f32 %v65_v2, %v30_v1  ;;  %v66_v8 = vld [vmem:[#allocation2] ss:$0 sm:$0xff]  ;;  %vm57_vm1 = vcmask 7168  }
  0x17   :  { %v40_v5 = vmul.f32 %v65_v2, %v31_v3 }
  0x18   :  { %v42_v6 = vsel %vm41_vm0, %v39_v4, 0.0 }
  0x19   :  { %43 = vadd.xlane.f32.xlu0 %v42_v6  ;;  %v45_v7 = vsel %vm41_vm0, %v40_v5, 0.0 }
  0x1d   :  { %46 = vadd.xlane.f32.xlu0 %v45_v7 }
  0xa6   :  { %v44_v9 = vpop.xlane.xlu0 %43 }
  0xa7   :  { %v55_v10 = vadd.f32 %v66_v8, %v44_v9 }
  0xa9   :  { %58 = vst.msk [vmem:[%s144_s3] sm:$0xff] %vm57_vm1, %v55_v10 }
  0xaa   :  { %v47_v11 = vpop.xlane.xlu0 %46 }
  0xab   :  { %v56_v12 = vadd.f32 %v66_v8, %v47_v11 }
  0xad   :  { %59 = vst.msk [vmem:[%s144_s3 + $0x8] sm:$0xff] %vm57_vm1, %v56_v12 }
  0xae   :  { %64 = vsyncpa [#allocation4], 1 }

</bundles_post_ra>
